<compile_context>
chip_gen: v6e
topology: v6e:2x2x1
jax: 0.10.0
libtpu: 0.0.40
codegen_flags: <defaults>
</compile_context>

<pallas_src>
import math
import functools

import jax
import jax.numpy as jnp
from jax.experimental import pallas as pl
from jax.experimental.pallas import tpu as pltpu


def _attention_kernel(seq_ref, key_ref, wseq_ref, bseq_ref, wkey_ref, bkey_ref,
                      o_ref, *, hidden_dim, seq_len, block_b, matmul_dtype):
    # seq_ref : (TB, N, H)   block of batch elements
    # key_ref : (TB, H)
    # wseq_ref/wkey_ref : (H, H), already (in, out) layout -> canonical contraction
    # bseq_ref/bkey_ref : (1, H) f32
    # o_ref   : (TB, H)
    TB, N, H = block_b, seq_len, hidden_dim

    seq_in = seq_ref[...]
    key_in = key_ref[...]
    if matmul_dtype is not None:
        # In-kernel cast (cheap VPU op on data already in VMEM). A wrapper-side
        # astype would be a separate XLA pass: f32 read + bf16 write + re-read.
        seq_in = seq_in.astype(matmul_dtype)
        key_in = key_in.astype(matmul_dtype)

    # Projections: one fused (TB*N, H) @ (H, H) MXU matmul for the whole batch
    # block, f32 accumulation. Weights are (in, out) so no transpose/relayout.
    seq_p = (jnp.dot(seq_in.reshape(TB * N, H), wseq_ref[...],
                     preferred_element_type=jnp.float32)
             + bseq_ref[...]).reshape(TB, N, H)               # (TB, N, H) f32
    key_p = (jnp.dot(key_in, wkey_ref[...],
                     preferred_element_type=jnp.float32)
             + bkey_ref[...])                                 # (TB, H) f32

    # Scores = <key'_b, seq'_{b,n}> / sqrt(H). An MXU formulation would be TB
    # batched M=1 matmuls wasting 127/128 (255/256) rows each; instead use the
    # otherwise-idle VPU (broadcast multiply) + XLU (lane reduction over H).
    inv_scale = 1.0 / math.sqrt(H)
    scores = jnp.sum(seq_p * key_p[:, None, :], axis=-1) * inv_scale   # (TB, N)

    # Numerically stable softmax over the sequence axis, f32, exact division
    # (EUP is not the bottleneck here; exact keeps rows summing to 1).
    scores = scores - jnp.max(scores, axis=-1, keepdims=True)
    p = jnp.exp(scores)
    p = p / jnp.sum(p, axis=-1, keepdims=True)                         # (TB, N)

    # answer_b = sum_n p[b,n] * seq'[b,n,:]  — VPU multiply + sublane reduction
    # over N instead of TB more M=1 MXU matmuls.
    answer = jnp.sum(p[:, :, None] * seq_p, axis=1)                    # (TB, H)

    # NOTE: at H < 128 this (TB, H) store is lane-masked; at the toy test size
    # the kernel is launch-overhead dominated, so this is accepted.
    o_ref[...] = answer.astype(o_ref.dtype)


def _choose_block_b(B, N, H, seq_itemsize, w_itemsize, *, num_cores=1,
                    vmem_budget_bytes=24 << 20):
    """Pick the batch-block size TB, accounting for all VMEM residents.

    Residents: double-buffered (H,H) weights + biases (constant), double-
    buffered (TB,N,H) seq / (TB,H) key / (TB,H) output blocks, and the live
    f32 (TB,N,H) projected-seq intermediate (plus same-size elementwise temps).
    The budget leaves headroom under v7x's 64 MiB physical VMEM and fits the
    explicitly raised 32 MiB scoped limit.
    """
    const_bytes = 2 * (2 * H * H * w_itemsize) + 2 * (2 * H * 4)
    per_row = (2 * N * H * seq_itemsize    # seq block, double-buffered
               + 2 * H * seq_itemsize      # key block, double-buffered
               + 2 * N * H * 4             # f32 seq_p + elementwise temporaries
               + 2 * H * 4)                # output block, double-buffered
    avail = max(vmem_budget_bytes - const_bytes, per_row)
    cap = max(1, avail // per_row)

    if num_cores > 1 and B > 1:
        # Megacore (v7x): ensure >= num_cores blocks so both TCs get work.
        # v5e/v6e have a single TC, so num_cores=1 never forces a split.
        cap = min(cap, max(1, B // num_cores))
    cap = min(cap, B)

    if cap >= B:
        return B
    # When splitting, TB must be a multiple of 8 (sublane tiling of the (TB,H)
    # key/output blocks). Prefer a divisor of B so no block is ever partial.
    for d in range(cap, 0, -1):
        if d % 8 == 0 and B % d == 0:
            return d
    if cap >= 8:
        # No dividing multiple of 8: use a ragged final block (Pallas masks the
        # out-of-range rows) instead of a host-side jnp.pad of seq.
        return (cap // 8) * 8
    # Tiny budget relative to one row: fall back to a single full-batch block
    # (always layout-legal); raise vmem_budget_bytes / vmem_limit_bytes if hit.
    return B


def attention_forward(seq, key, params, choose, *, block_b=None,
                      matmul_dtype=None, num_cores=1, interpret=False):
    """seq: (B, N, H), key: (B, H).  Returns (B, H) float32.

    matmul_dtype: e.g. jnp.bfloat16 to feed the MXU in bf16 (recommended on
    v5e/v6e/v7x — all generations have bf16-native MXUs); the cast happens
    inside the kernel, accumulation and softmax stay f32.
    num_cores: pass 2 on v7x so the grid splits across both TensorCores.
    """
    B, N, H = seq.shape
    assert key.shape == (B, H)

    w1, b1, w2, b2 = params["w1"], params["b1"], params["w2"], params["b2"]
    if choose:
        w_seq, b_seq, w_key, b_key = w1, b1, w2, b2
    else:
        w_seq, b_seq, w_key, b_key = w2, b2, w1, b1

    # One-time (H,H) transpose to (in, out) layout so the kernel contracts the
    # canonical (LHS last dim, RHS dim 0) pair — no per-step weight relayout.
    w_dtype = matmul_dtype if matmul_dtype is not None else jnp.float32
    w_seq_t = jnp.transpose(w_seq).astype(w_dtype)
    w_key_t = jnp.transpose(w_key).astype(w_dtype)
    b_seq_2d = b_seq.reshape(1, H).astype(jnp.float32)
    b_key_2d = b_key.reshape(1, H).astype(jnp.float32)

    TB = block_b if block_b is not None else _choose_block_b(
        B, N, H,
        jnp.dtype(seq.dtype).itemsize, jnp.dtype(w_dtype).itemsize,
        num_cores=num_cores)
    num_blocks = pl.cdiv(B, TB)

    kernel = functools.partial(_attention_kernel, hidden_dim=H, seq_len=N,
                               block_b=TB, matmul_dtype=matmul_dtype)

    out = pl.pallas_call(
        kernel,
        out_shape=jax.ShapeDtypeStruct((B, H), jnp.float32),
        grid_spec=pltpu.PrefetchScalarGridSpec(
            num_scalar_prefetch=0,
            grid=(num_blocks,),
            in_specs=[
                pl.BlockSpec((TB, N, H), lambda i: (i, 0, 0)),  # seq block
                pl.BlockSpec((TB, H), lambda i: (i, 0)),        # key block
                pl.BlockSpec((H, H), lambda i: (0, 0)),         # W_seq (in,out)
                pl.BlockSpec((1, H), lambda i: (0, 0)),         # b_seq
                pl.BlockSpec((H, H), lambda i: (0, 0)),         # W_key (in,out)
                pl.BlockSpec((1, H), lambda i: (0, 0)),         # b_key
            ],
            out_specs=pl.BlockSpec((TB, H), lambda i: (i, 0)),
        ),
        compiler_params=pltpu.CompilerParams(
            dimension_semantics=("parallel",),
            vmem_limit_bytes=32 << 20),   # safe on v5e/v6e (128 MiB) & v7x (64 MiB)
        interpret=interpret,
    )(seq, key, w_seq_t, b_seq_2d, w_key_t, b_key_2d)

    return out


def init_params(key, hidden_dim):
    """nn.Linear-style init: U(-1/sqrt(H), 1/sqrt(H)), torch (out, in) layout."""
    k1, k2, k3, k4 = jax.random.split(key, 4)
    bound = 1.0 / math.sqrt(hidden_dim)
    shape_w = (hidden_dim, hidden_dim)
    return {
        "w1": jax.random.uniform(k1, shape_w, jnp.float32, -bound, bound),
        "b1": jax.random.uniform(k2, (hidden_dim,), jnp.float32, -bound, bound),
        "w2": jax.random.uniform(k3, shape_w, jnp.float32, -bound, bound),
        "b2": jax.random.uniform(k4, (hidden_dim,), jnp.float32, -bound, bound),
    }


def attention_reference(seq, key, params, choose):
    """Pure-JAX reference mirroring the PyTorch forward."""
    H = seq.shape[-1]
    if choose:
        seq_p = seq @ params["w1"].T + params["b1"]
        key_p = (key @ params["w2"].T + params["b2"])[:, None, :]
    else:
        seq_p = seq @ params["w2"].T + params["b2"]
        key_p = (key @ params["w1"].T + params["b1"])[:, None, :]
    value = jnp.matmul(key_p, jnp.swapaxes(seq_p, -1, -2)) / math.sqrt(H)
    value = jax.nn.softmax(value, axis=-1)
    answer = jnp.matmul(value, seq_p)
    return answer[:, 0, :]


if __name__ == "__main__":
    B, N, H = 2, 8, 32  # batch, sequence length, hidden_dim

    root = jax.random.PRNGKey(0)
    k_seq, k_key, k_params = jax.random.split(root, 3)

    seq = jax.random.normal(k_seq, (B, N, H), jnp.float32)
    key = jax.random.normal(k_key, (B, H), jnp.float32)
    params = init_params(k_params, H)

    out_true = attention_forward(seq, key, params, choose=True)
    out_false = attention_forward(seq, key, params, choose=False)
    jax.block_until_ready((out_true, out_false))

    ref_true = attention_reference(seq, key, params, choose=True)
    ref_false = attention_reference(seq, key, params, choose=False)

    assert out_true.shape == (B, H)
    assert out_false.shape == (B, H)
    # Softmax now uses exact division (no approx reciprocal); remaining
    # mismatch vs. the XLA reference comes only from default-precision f32
    # matmul (bf16 MXU passes) ordering differences between Mosaic and XLA,
    # so the bound is tightened 2x vs. the previous 1e-2.
    assert jnp.allclose(out_true, ref_true, atol=5e-3, rtol=5e-3)
    assert jnp.allclose(out_false, ref_false, atol=5e-3, rtol=5e-3)

    print("KERNEL_OK")
</pallas_src>

<mosaic_0001>
module attributes {stable_mosaic.version = 11 : i64} {
  func.func @_attention_kernel(%arg0: i32, %arg1: memref<2x8x32xf32, #tpu.memory_space<vmem>>, %arg2: memref<2x32xf32, #tpu.memory_space<vmem>>, %arg3: memref<32x32xf32, #tpu.memory_space<vmem>>, %arg4: memref<1x32xf32, #tpu.memory_space<vmem>>, %arg5: memref<32x32xf32, #tpu.memory_space<vmem>>, %arg6: memref<1x32xf32, #tpu.memory_space<vmem>>, %arg7: memref<2x32xf32, #tpu.memory_space<vmem>>) attributes {dimension_semantics = [#tpu.dimension_semantics<parallel>], iteration_bounds = array<i64: 1>, scalar_prefetch = 0 : i64, scratch_operands = 0 : i64, tpu.core_type = #tpu.core_type<tc>, window_params = [{transform_indices = @transform_0, window_bounds = array<i64: 2, 8, 32>}, {transform_indices = @transform_1, window_bounds = array<i64: 2, 32>}, {pipeline_mode = #tpu.pipeline_mode<synchronous>, transform_indices = @transform_2, window_bounds = array<i64: 32, 32>}, {pipeline_mode = #tpu.pipeline_mode<synchronous>, transform_indices = @transform_3, window_bounds = array<i64: 1, 32>}, {pipeline_mode = #tpu.pipeline_mode<synchronous>, transform_indices = @transform_4, window_bounds = array<i64: 32, 32>}, {pipeline_mode = #tpu.pipeline_mode<synchronous>, transform_indices = @transform_5, window_bounds = array<i64: 1, 32>}, {transform_indices = @transform_6, window_bounds = array<i64: 2, 32>}]} {
    %c0 = arith.constant 0 : index
    %c0_0 = arith.constant 0 : index
    %c0_1 = arith.constant 0 : index
    %0 = vector.load %arg1[%c0, %c0_0, %c0_1] : memref<2x8x32xf32, #tpu.memory_space<vmem>>, vector<2x8x32xf32>
    %c0_2 = arith.constant 0 : index
    %c0_3 = arith.constant 0 : index
    %1 = vector.load %arg2[%c0_2, %c0_3] : memref<2x32xf32, #tpu.memory_space<vmem>>, vector<2x32xf32>
    %2 = vector.shape_cast %0 : vector<2x8x32xf32> to vector<16x32xf32>
    %c0_4 = arith.constant 0 : index
    %c0_5 = arith.constant 0 : index
    %3 = vector.load %arg3[%c0_4, %c0_5] : memref<32x32xf32, #tpu.memory_space<vmem>>, vector<32x32xf32>
    %cst = arith.constant dense<0.000000e+00> : vector<16x32xf32>
    %4 = tpu.matmul %2, %3, %cst {dimension_numbers = #tpu.dot_dimension_numbers<[1], [0], [0], [1], [0, 0, 1, 1], [], []>} : vector<16x32xf32>, vector<32x32xf32>, vector<16x32xf32> -> vector<16x32xf32>
    %c0_6 = arith.constant 0 : index
    %c0_7 = arith.constant 0 : index
    %5 = vector.load %arg4[%c0_6, %c0_7] : memref<1x32xf32, #tpu.memory_space<vmem>>, vector<1x32xf32>
    %6 = vector.broadcast %5 : vector<1x32xf32> to vector<16x32xf32>
    %7 = arith.addf %4, %6 : vector<16x32xf32>
    %8 = vector.shape_cast %7 : vector<16x32xf32> to vector<2x8x32xf32>
    %c0_8 = arith.constant 0 : index
    %c0_9 = arith.constant 0 : index
    %9 = vector.load %arg5[%c0_8, %c0_9] : memref<32x32xf32, #tpu.memory_space<vmem>>, vector<32x32xf32>
    %cst_10 = arith.constant dense<0.000000e+00> : vector<2x32xf32>
    %10 = tpu.matmul %1, %9, %cst_10 {dimension_numbers = #tpu.dot_dimension_numbers<[1], [0], [0], [1], [0, 0, 1, 1], [], []>} : vector<2x32xf32>, vector<32x32xf32>, vector<2x32xf32> -> vector<2x32xf32>
    %c0_11 = arith.constant 0 : index
    %c0_12 = arith.constant 0 : index
    %11 = vector.load %arg6[%c0_11, %c0_12] : memref<1x32xf32, #tpu.memory_space<vmem>>, vector<1x32xf32>
    %12 = vector.broadcast %11 : vector<1x32xf32> to vector<2x32xf32>
    %13 = arith.addf %10, %12 : vector<2x32xf32>
    %14 = vector.shape_cast %13 : vector<2x32xf32> to vector<2x1x32xf32>
    %15 = vector.broadcast %14 : vector<2x1x32xf32> to vector<2x8x32xf32>
    %16 = arith.mulf %8, %15 : vector<2x8x32xf32>
    %cst_13 = arith.constant dense<0.000000e+00> : vector<2x8xf32>
    %17 = vector.multi_reduction <add>, %16, %cst_13 [2] : vector<2x8x32xf32> to vector<2x8xf32>
    %cst_14 = arith.constant 0.176776692 : f32
    %18 = vector.broadcast %cst_14 : f32 to vector<2x8xf32>
    %19 = arith.mulf %17, %18 : vector<2x8xf32>
    %cst_15 = arith.constant dense<0xFF800000> : vector<2xf32>
    %20 = vector.multi_reduction <maximumf>, %19, %cst_15 [1] : vector<2x8xf32> to vector<2xf32>
    %21 = vector.shape_cast %20 : vector<2xf32> to vector<2x1xf32>
    %22 = vector.broadcast %21 : vector<2x1xf32> to vector<2x8xf32>
    %23 = arith.subf %19, %22 : vector<2x8xf32>
    %24 = math.exp %23 : vector<2x8xf32>
    %cst_16 = arith.constant dense<0.000000e+00> : vector<2xf32>
    %25 = vector.multi_reduction <add>, %24, %cst_16 [1] : vector<2x8xf32> to vector<2xf32>
    %26 = vector.shape_cast %25 : vector<2xf32> to vector<2x1xf32>
    %27 = vector.broadcast %26 : vector<2x1xf32> to vector<2x8xf32>
    %28 = arith.divf %24, %27 : vector<2x8xf32>
    %29 = vector.shape_cast %28 : vector<2x8xf32> to vector<2x8x1xf32>
    %30 = vector.broadcast %29 : vector<2x8x1xf32> to vector<2x8x32xf32>
    %31 = arith.mulf %30, %8 : vector<2x8x32xf32>
    %cst_17 = arith.constant dense<0.000000e+00> : vector<2x32xf32>
    %32 = vector.multi_reduction <add>, %31, %cst_17 [1] : vector<2x8x32xf32> to vector<2x32xf32>
    %c0_18 = arith.constant 0 : index
    %c0_19 = arith.constant 0 : index
    %33 = vector.load %arg7[%c0_18, %c0_19] : memref<2x32xf32, #tpu.memory_space<vmem>>, vector<2x32xf32>
    tpu.vector_store %arg7[%c0_18, %c0_19], %32 {strides = array<i32>} : memref<2x32xf32, #tpu.memory_space<vmem>>, vector<2x32xf32>,
    return
  }
  func.func @transform_0(%arg0: i32) -> (i32, i32, i32) {
    %c0_i32 = arith.constant 0 : i32
    %c0_i32_0 = arith.constant 0 : i32
    %c0_i32_1 = arith.constant 0 : i32
    return %arg0, %c0_i32, %c0_i32_0 : i32, i32, i32
  }
  func.func @transform_1(%arg0: i32) -> (i32, i32) {
    %c0_i32 = arith.constant 0 : i32
    %c0_i32_0 = arith.constant 0 : i32
    return %arg0, %c0_i32 : i32, i32
  }
  func.func @transform_2(%arg0: i32) -> (i32, i32) {
    %c0_i32 = arith.constant 0 : i32
    %c0_i32_0 = arith.constant 0 : i32
    %c0_i32_1 = arith.constant 0 : i32
    return %c0_i32, %c0_i32_0 : i32, i32
  }
  func.func @transform_3(%arg0: i32) -> (i32, i32) {
    %c0_i32 = arith.constant 0 : i32
    %c0_i32_0 = arith.constant 0 : i32
    %c0_i32_1 = arith.constant 0 : i32
    return %c0_i32, %c0_i32_0 : i32, i32
  }
  func.func @transform_4(%arg0: i32) -> (i32, i32) {
    %c0_i32 = arith.constant 0 : i32
    %c0_i32_0 = arith.constant 0 : i32
    %c0_i32_1 = arith.constant 0 : i32
    return %c0_i32, %c0_i32_0 : i32, i32
  }
  func.func @transform_5(%arg0: i32) -> (i32, i32) {
    %c0_i32 = arith.constant 0 : i32
    %c0_i32_0 = arith.constant 0 : i32
    %c0_i32_1 = arith.constant 0 : i32
    return %c0_i32, %c0_i32_0 : i32, i32
  }
  func.func @transform_6(%arg0: i32) -> (i32, i32) {
    %c0_i32 = arith.constant 0 : i32
    %c0_i32_0 = arith.constant 0 : i32
    return %arg0, %c0_i32 : i32, i32
  }
}

</mosaic_0001>

<bundles_post_ra>
// kernel: tpu_custom_call.1
= control target key start
LH: loop header
LB: loop body
LE: loop exit
PB: predicated region body
PF: predicated region fallthrough
CT: control target
= control target key end

     0   :  { %11 = vsyncpa [#allocation3], 0  ;;  %s673_s0 = inlined_call_operand.hbm [shape: f32[2,8,32], index: 0, kind: input, shape index: {}]   ;;  %s674_s1 = inlined_call_operand.hbm [shape: f32[2,32], index: 1, kind: input, shape index: {}]   ;;  %s675_s2 = inlined_call_operand.hbm [shape: f32[32,32], index: 2, kind: input, shape index: {}]   ;;  %s676_s3 = inlined_call_operand.vmem [shape: f32[1,32], index: 3, kind: input, shape index: {}]   ;;  %s677_s4 = inlined_call_operand.hbm [shape: f32[32,32], index: 4, kind: input, shape index: {}]   ;;  %s678_s5 = inlined_call_operand.vmem [shape: f32[1,32], index: 5, kind: input, shape index: {}]   ;;  %s679_s6 = inlined_call_operand.hbm [shape: f32[2,32], index: 6, kind: output, shape index: {}]  }
   0x1   :  { %12 = vsyncpa [#allocation6], 0 }
   0x2   :  { %13 = vsyncpa [#allocation9], 0 }
   0x3   :  { %14 = vsyncpa [#allocation4], 0  ;;  %s588_s21 = smov [#allocation5]   ;;  %s589_s23 = smov [#allocation2]  }
   0x4   :  { %s33_s22 = sshll.u32 %s588_s21, 4  ;;  %s20_s24 = sshll.u32 %s589_s23, 4  ;;  %s34_s22 = int_to_ptr.vmem [resolvable:$true] %s33_s22  ;;  %s21_s24 = int_to_ptr.vmem [resolvable:$true] %s20_s24 }
   0x5   :  { %s488_s25 = scalar_lea.vmem %s34_s22, 32  ;;  %p493_p1 = scmp.lt.s32.totalorder %s34_s22, %s34_s22 }
   0x6   :  { %p489_p0 = scmp.ne.s32.totalorder %s34_s22, %s488_s25  ;;  %p494_p2 = scmp.lt.s32.totalorder %s488_s25, %s488_s25 }
   0x8   :  { %p495_p3 = por %p494_p2, %p493_p1 }
   0xa   :  { %p496_p4 = pnand %p495_p3, %p489_p0 }
   0xc   :  { %499 = shalt.err (!%p496_p4)
}
   0xd   :  { %36 = dma.hbm_to_vmem [thread:$0]  %s674_s1, 32, %s34_s22, [#allocation6]  }
   0xe   :  { %s508_s28 = scalar_lea.vmem %s21_s24, 256  ;;  %p513_p6 = scmp.lt.s32.totalorder %s21_s24, %s21_s24 }
   0xf   :  { %p509_p5 = scmp.ne.s32.totalorder %s21_s24, %s508_s28  ;;  %p514_p7 = scmp.lt.s32.totalorder %s508_s28, %s508_s28 }
  0x11   :  { %p515_p8 = por %p514_p7, %p513_p6 }
  0x13   :  { %p516_p9 = pnand %p515_p8, %p509_p5 }
  0x15   :  { %519 = shalt.err (!%p516_p9)
}
  0x16   :  { %s590_s29 = smov 128   ;;  %s591_s30 = smov 8  }
  0x17   :  { %26 = dma.hbm_to_vmem [thread:$0]  %s673_s0, 256, %s21_s24, [#allocation3], %s590_s29, %s590_s29, %s591_s30  }
  0x18   :  { %s592_s9 = smov [#allocation7]   ;;  %s593_s11 = smov [#allocation8]  }
  0x19   :  { %s42_s10 = sshll.u32 %s592_s9, 4  ;;  %s56_s12 = sshll.u32 %s593_s11, 4  ;;  %s43_s10 = int_to_ptr.vmem [resolvable:$true] %s42_s10  ;;  %s57_s12 = int_to_ptr.vmem [resolvable:$true] %s56_s12 }
  0x1a   :  { %s528_s1 = scalar_lea.vmem %s43_s10, 512  ;;  %p533_p11 = scmp.lt.s32.totalorder %s43_s10, %s43_s10 }
  0x1b   :  { %p529_p10 = scmp.ne.s32.totalorder %s43_s10, %s528_s1  ;;  %p534_p12 = scmp.lt.s32.totalorder %s528_s1, %s528_s1 }
  0x1d   :  { %p535_p13 = por %p534_p12, %p533_p11 }
  0x1f   :  { %p536_p0 = pnand %p535_p13, %p529_p10 }
  0x21   :  { %539 = shalt.err (!%p536_p0)
}
  0x22   :  { %48 = dma.hbm_to_vmem [thread:$0]  %s675_s2, 512, %s43_s10, [#allocation6], %s590_s29, %s590_s29, %s591_s30  }
  0x23   :  { %s548_s15 = scalar_lea.vmem %s57_s12, 512  ;;  %p553_p2 = scmp.lt.s32.totalorder %s57_s12, %s57_s12 }
  0x24   :  { %p549_p1 = scmp.ne.s32.totalorder %s57_s12, %s548_s15  ;;  %p554_p3 = scmp.lt.s32.totalorder %s548_s15, %s548_s15 }
  0x26   :  { %p555_p4 = por %p554_p3, %p553_p2 }
  0x28   :  { %p556_p5 = pnand %p555_p4, %p549_p1 }
  0x2a   :  { %559 = shalt.err (!%p556_p5)
}
  0x2b   :  { %62 = dma.hbm_to_vmem [thread:$0]  %s677_s4, 512, %s57_s12, [#allocation9], %s590_s29, %s590_s29, %s591_s30  }
  0x2c   :  { %580 = dma.done.wait [#allocation3], 256  }
  0x2d   :  { %581 = vsyncadd [#allocation3], 4294967040 }
  0x2e   :  { %582 = dma.done.wait [#allocation6], 544  }
  0x2f   :  { %583 = vsyncadd [#allocation6], 4294966752 }
  0x30   :  { %584 = dma.done.wait [#allocation9], 512  }
  0x31   :  { %585 = vsyncadd [#allocation9], 4294966784  ;;  %v594_v0 = vmov 0.0   ;;  %vm595_vm0 = vmmov 0   ;;  %v176_v1 = vld [vmem:[#allocation8 + $0x18] sm:$0xff]  ;;  %v175_v3 = vld [vmem:[#allocation8 + $0x10] sm:$0xff]  ;;  %v261_v14 = vlaneseq }
  0x32   :  { %448 = vmatprep.subr.mxu1 %v594_v0  ;;  %456 = vmatprep.mubr.msk.f32.mxu1 %vm595_vm0, %v594_v0  ;;  %v83_v2 = vld [vmem:[#allocation7 + $0x18] sm:$0xff]  ;;  %v82_v4 = vld [vmem:[#allocation7 + $0x10] sm:$0xff]  ;;  %v174_v5 = vld [vmem:[#allocation8 + $0x8] sm:$0xff]  ;;  %vm91_vm1 = vcmask 261120   ;;  %v596_v12 = vmov 1966171168  }
  0x33   :  { %449 = vmatpush3.msra.mxu1 %v176_v1  ;;  %437 = vmatprep.subr.mxu0 %v83_v2  ;;  %v81_v6 = vld [vmem:[#allocation7 + $0x8] sm:$0xff]  ;;  %v173_v7 = vld [vmem:[#allocation8] sm:$0xff]  ;;  %v79_v9 = vld [vmem:[#allocation5] sm:$0x3]  ;;  %v259_v13 = vunpack.c.l.s4 %v596_v12  ;;  %v649_v16 = vshrl.u32 %v261_v14, 7  ;;  %v303_v38 = vand.u32 127, %v261_v14 }
  0x34   :  { %450 = vmatprep.subr.mxu1 %v594_v0  ;;  %438 = vmatpush3.msra.mxu0 %v83_v2  ;;  %v80_v8 = vld [vmem:[#allocation7] sm:$0xff]  ;;  %v77_v10 = vld [vmem:[#allocation2] sm:$0xff]  ;;  %v78_v11 = vld [vmem:[#allocation2 + $0x8] sm:$0xff]  ;;  %vm312_vm2 = vcmask 1041409   ;;  %vm315_vm3 = vcmask 58368   ;;  %v597_v48 = vmov 0  }
  0x35   :  { %451 = vmatpush3.msra.mxu1 %v175_v3  ;;  %439 = vmatprep.subr.mxu0 %v82_v4  ;;  %v260_v15 = vunpack.c.0.s8 %v259_v13  ;;  %v424_v17 = vld [vmem:[%s678_s5] ss:$0 sm:$0xff]  ;;  %v282_v24 = vsub.s32 0, %v649_v16  ;;  %v306_v40 = vsub.s32 %v303_v38, %v649_v16  ;;  %v326_v49 = vsub.s32 1, %v649_v16 }
  0x36   :  { %452 = vmatprep.subr.mxu1 %v594_v0  ;;  %440 = vmatpush3.msra.mxu0 %v82_v4  ;;  %v421_v25 = vld [vmem:[%s676_s3] ss:$0 sm:$0xff]  ;;  %s598_s3 = smov [#allocation10]   ;;  %vm402_vm4 = vcmask 254976  }
  0x37   :  { %453 = vmatpush3.msra.mxu1 %v174_v5  ;;  %441 = vmatprep.subr.mxu0 %v81_v6  ;;  %v263_v18 = vsub.s32 %v260_v15, %v649_v16  ;;  %s410_s5 = sshll.u32 %s598_s3, 4  ;;  %s411_s5 = int_to_ptr.vmem [resolvable:$true] %s410_s5 }
  0x38   :  { %454 = vmatprep.subr.mxu1 %v594_v0  ;;  %442 = vmatpush3.msra.mxu0 %v81_v6  ;;  %s560_s19 = scalar_lea.vmem %s411_s5, 32  ;;  %p565_p7 = scmp.lt.s32.totalorder %s411_s5, %s411_s5 }
  0x39   :  { %455 = vmatpush3.msra.mxu1 %v173_v7  ;;  %443 = vmatprep.subr.mxu0 %v80_v8  ;;  %p561_p6 = scmp.ne.s32.totalorder %s411_s5, %s560_s19  ;;  %p566_p8 = scmp.lt.s32.totalorder %s560_s19, %s560_s19 }
  0x3a   :  { %457 = vmatmul.mubr.msk.f32.vlgmr.msra.gmra.mxu1 %vm91_vm1, %v79_v9  ;;  %444 = vmatpush3.msra.mxu0 %v80_v8 }
  0x3b   :  { %445 = vmatprep.mubr.msk.f32.mxu0 %vm91_vm1, %v77_v10  ;;  %471 = vset.pattern.permute.xlu0 %v597_v48  ;;  %p567_p9 = por %p566_p8, %p565_p7 }
  0x3c   :  { %446 = vmatmul.mubr.msk.f32.vlgmr.msra.gmra.mxu0 %vm91_vm1, %v78_v11  ;;  %470 = vset.pattern.permute.xlu1 %v597_v48 }
  0x3d   :  { %p568_p10 = pnand %p567_p9, %p561_p6 }
  0xfa   :  { %v253_v19 = vpop.f32.mrf.mxu1 }
  0xfb   :  { %v254_v20 = vadd.f32 %v424_v17, %v253_v19 }
  0xfc   :  { %v447_v21 = vpop.f32.mrf.mxu0  ;;  %v458_v22 = vpop.f32.mrf.mxu1 }
  0xfd   :  { %v264_v23 = vrot.slane %v254_v20, %v263_v18  ;;  %v170_v32 = vadd.f32 %v447_v21, %v421_v25 }
  0xfe   :  { %v164_v26 = vpop.f32.mrf.mxu0 }
  0xff   :  { %v265_v27 = vcombine.high %v264_v23, %v264_v23  ;;  %v272_v28 = vrot.slane %v264_v23, %v263_v18  ;;  %v165_v29 = vadd.f32 %v421_v25, %v164_v26 }
 0x101   :  { %v283_v30 = vrot.slane %v272_v28, %v282_v24  ;;  %v279_v31 = vrot.slane %v265_v27, %v263_v18 }
 0x103   :  { %v290_v33 = vmul.f32 %v283_v30, %v165_v29  ;;  %v287_v34 = vrot.slane %v279_v31, %v282_v24 }
 0x105   :  { %v292_v35 = vsel %vm91_vm1, %v290_v33, 0.0  ;;  %v291_v36 = vmul.f32 %v287_v34, %v170_v32 }
 0x106   :  { %293 = vadd.xlane.f32.xlu0 %v292_v35 }
 0x107   :  { %v295_v37 = vsel %vm91_vm1, %v291_v36, 0.0 }
 0x10a   :  { %296 = vadd.xlane.f32.xlu0 %v295_v37 }
 0x18f   :  { %v294_v39 = vpop.xlane.xlu0 %293 }
 0x190   :  { %v298_v41 = vmul.f32 0.17677669, %v294_v39 }
 0x192   :  { %v307_v44 = vrot.slane %v298_v41, %v306_v40 }
 0x193   :  { %v297_v42 = vpop.xlane.xlu0 %296 }
 0x194   :  { %v299_v43 = vmul.f32 0.17677669, %v297_v42 }
 0x196   :  { %v311_v45 = vrot.slane %v299_v43, %v306_v40 }
 0x198   :  { %v313_v46 = vsel %vm312_vm2, %v311_v45, %v307_v44 }
 0x199   :  { %v316_v47 = vsel %vm315_vm3, %v313_v46, -inf }
 0x19a   :  { %317 = vmax.xlane.f32.xlu1 %v316_v47 }
 0x223   :  { %v318_v50 = vpop.xlane.xlu1 %317 }
 0x224   :  { %v323_v51 = vrot.slane %v318_v50, %v282_v24  ;;  %v327_v52 = vrot.slane %v318_v50, %v326_v49 }
 0x226   :  { %v330_v53 = vsub.f32 %v298_v41, %v323_v51  ;;  %v331_v54 = vsub.f32 %v299_v43, %v327_v52 }
 0x228   :  { %v332_v55 = vmul.f32 1.442695, %v330_v53  ;;  %v334_v56 = vmul.f32 1.442695, %v331_v54 }
 0x22a   :  { %472 = vpow2.f32 %v332_v55 }
 0x22b   :  { %474 = vpow2.f32 %v334_v56 }
 0x237   :  { %v473_v57 = vpop.eup %472 }
 0x238   :  { %v475_v58 = vpop.eup %474  ;;  %339 = vperm.xlu1 %470, %v473_v57  }
 0x239   :  { %342 = vperm.xlu0 %471, %v475_v58  }
 0x2b3   :  { %v340_v59 = vpop.permute.xlu1 %339 }
 0x2b4   :  { %v343_v60 = vpop.permute.xlu0 %342  ;;  %v347_v61 = vrot.slane %v340_v59, %v306_v40 }
 0x2b5   :  { %v351_v62 = vrot.slane %v343_v60, %v306_v40 }
 0x2b7   :  { %v352_v63 = vsel %vm312_vm2, %v351_v62, %v347_v61 }
 0x2b8   :  { %v354_v0 = vsel %vm315_vm3, %v352_v63, 0.0 }
 0x2b9   :  { %355 = vadd.xlane.f32.xlu1 %v354_v0 }
 0x342   :  { %v356_v1 = vpop.xlane.xlu1 %355 }
 0x343   :  { %v361_v2 = vrot.slane %v356_v1, %v282_v24  ;;  %v365_v3 = vrot.slane %v356_v1, %v326_v49 }
 0x345   :  { %476 = vrcp.f32 %v361_v2 }
 0x346   :  { %478 = vrcp.f32 %v365_v3 }
 0x352   :  { %v477_v4 = vpop.eup %476 }
 0x353   :  { %v369_v5 = vmul.f32 %v477_v4, %v473_v57  ;;  %v479_v6 = vpop.eup %478 }
 0x354   :  { %v371_v7 = vmul.f32 %v479_v6, %v475_v58 }
 0x355   :  { %374 = vperm.xlu0 %471, %v369_v5  }
 0x359   :  { %379 = vperm.xlu0 %471, %v371_v7  }
 0x3d0   :  { %v375_v8 = vpop.permute.xlu0 %374 }
 0x3d1   :  { %v382_v9 = vmul.f32 %v375_v8, %v165_v29 }
 0x3d3   :  { %v384_v10 = vsel %vm91_vm1, %v382_v9, 0.0 }
 0x3d4   :  { %v385_v11 = vrot.slane %v384_v10, 4  ;;  %v380_v12 = vpop.permute.xlu0 %379 }
 0x3d5   :  { %v383_v13 = vmul.f32 %v380_v12, %v170_v32 }
 0x3d6   :  { %v386_v14 = vadd.f32 %v385_v11, %v384_v10 }
 0x3d7   :  { %v391_v15 = vsel %vm91_vm1, %v383_v13, 0.0 }
 0x3d8   :  { %v387_v16 = vrot.slane %v386_v14, 2  ;;  %v392_v17 = vrot.slane %v391_v15, 4 }
 0x3da   :  { %v388_v18 = vadd.f32 %v387_v16, %v386_v14  ;;  %v393_v19 = vadd.f32 %v392_v17, %v391_v15 }
 0x3dc   :  { %v394_v20 = vrot.slane %v393_v19, 2  ;;  %v389_v21 = vrot.slane %v388_v18, 1 }
 0x3de   :  { %v395_v22 = vadd.f32 %v394_v20, %v393_v19  ;;  %v390_v24 = vadd.f32 %v389_v21, %v388_v18 }
 0x3e0   :  { %v396_v23 = vrot.slane %v395_v22, 1 }
 0x3e2   :  { %v397_v25 = vadd.f32 %v396_v23, %v395_v22 }
 0x3e4   :  { %v400_v26 = vsel %vm312_vm2, %v397_v25, %v390_v24 }
 0x3e5   :  { %403 = vst.msk [vmem:[#allocation10] sm:$0x3] %vm402_vm4, %v400_v26 }
 0x3e6   :  { %571 = shalt.err (!%p568_p10)
}
 0x3e7   :  { %413 = dma.vmem_to_hbm [thread:$0]  %s411_s5, 32, %s679_s6, [#allocation4]  }
 0x3e8   :  { %586 = dma.done.wait [#allocation4], 32  }
 0x3e9   :  { %587 = vsyncadd [#allocation4], 4294967264 }
 0x3ea   :  { %417 = vsyncpa [#allocation3], 1 }
 0x3eb   :  { %418 = vsyncpa [#allocation6], 1 }
 0x3ec   :  { %419 = vsyncpa [#allocation9], 1 }
 0x3ed   :  { %420 = vsyncpa [#allocation4], 1 }

</bundles_post_ra>
